<compile_context>
chip_gen: v6e
topology: v6e:2x2x1
jax: 0.10.0
libtpu: 0.0.40
codegen_flags: <defaults>
</compile_context>

<pallas_src>
import jax
import jax.numpy as jnp
from jax import lax
from jax.experimental import pallas as pl
from jax.experimental.pallas import tpu as pltpu


def _round_up(x, m):
    return (x + m - 1) // m * m


def _mlp_kernel(x_ref, wgu_ref, wd_ref, o_ref, acc_ref):
    j = pl.program_id(1)

    tn = wgu_ref.shape[1]
    hidden = wgu_ref.shape[2]

    x = x_ref[...]
    # Fused gate+up projection: one MXU matmul against the stacked
    # (2*tn, hidden) weight block, contracting on the hidden axis (weights
    # are kept in the PyTorch (out, in) layout, i.e. this computes x @ W.T).
    # The reshape only collapses the leading stack dim; the (tn, hidden)
    # minor tile is preserved, so it is layout-free.
    w_gu = wgu_ref[...].reshape(2 * tn, hidden)
    gu = lax.dot_general(x, w_gu, (((1,), (1,)), ((), ())),
                         preferred_element_type=jnp.float32)
    gate = gu[:, :tn]
    up = gu[:, tn:]
    # SiLU(gate) * up in f32 (sigmoid goes to the EUP slot).
    act = (gate * jax.nn.sigmoid(gate)) * up
    # Partial down projection for this intermediate tile (f32 accumulation).
    partial = lax.dot_general(act.astype(wd_ref.dtype), wd_ref[...],
                              (((1,), (1,)), ((), ())),
                              preferred_element_type=jnp.float32)

    @pl.when(j == 0)
    def _assign():
        acc_ref[...] = partial

    @pl.when(j > 0)
    def _accumulate():
        acc_ref[...] += partial

    @pl.when(j == pl.num_programs(1) - 1)
    def _finalize():
        o_ref[...] = acc_ref[...].astype(o_ref.dtype)


def prepare_qwen2_mlp_weights(w_gate, w_up, w_down):
    """One-time weight prep (call once, OUTSIDE the per-step path).

    Keeps the PyTorch (out_features, in_features) layout (no transposes);
    only stacks gate and up so they stream as a single DMA block and a single
    fused matmul per grid step.
    """
    inter, hidden = w_gate.shape
    assert w_up.shape == (inter, hidden)
    assert w_down.shape == (hidden, inter)
    return jnp.stack([w_gate, w_up], axis=0), w_down


def _pick_inter_tile(inter, requested):
    """Largest multiple of 128 that divides `inter` and is <= requested."""
    hi = min(requested, inter)
    d = (hi // 128) * 128
    while d >= 128:
        if inter % d == 0:
            return d
        d -= 128
    # Toy / odd sizes only: largest divisor of inter <= requested.
    for d in range(hi, 0, -1):
        if inter % d == 0:
            return d
    return inter


def _vmem_cap_bytes():
    """Generation-aware VMEM budget, leaving headroom for compiler scratch."""
    try:
        phys = int(pltpu.get_tpu_info().vmem_capacity_bytes)
    except Exception:
        phys = 0
    if phys <= 0:
        phys = 64 * 1024 * 1024  # conservative fallback (v7x: 64 MiB / core)
    return phys - max(16 * 1024 * 1024, phys // 4)   # 48 MiB on v7x, 96 MiB on v5e/v6e


def _vmem_estimate(tm, tn, hidden, x_bytes, w_bytes, o_bytes):
    return (2 * tm * hidden * x_bytes          # x block (double-buffered)
            + 2 * 2 * tn * hidden * w_bytes    # stacked gate+up block (double-buffered)
            + 2 * hidden * tn * w_bytes        # down-proj block (double-buffered)
            + 2 * tm * hidden * o_bytes        # output block (double-buffered)
            + tm * hidden * 4)                 # f32 accumulator scratch


def qwen2_mlp_prepared(x, w_gu, w_down, *, row_tile=512, inter_tile=512,
                       vmem_cap_bytes=None):
    """Qwen2 MLP forward with pre-prepared weights.

    x:      (..., hidden)
    w_gu:   (2, intermediate, hidden)   -- stacked [W_gate; W_up], PyTorch layout
    w_down: (hidden, intermediate)      -- PyTorch layout
    """
    orig_shape = x.shape
    hidden = orig_shape[-1]
    two, inter, h2 = w_gu.shape
    assert two == 2 and h2 == hidden
    assert w_down.shape == (hidden, inter)

    out_dtype = jnp.result_type(x.dtype, w_gu.dtype)

    x2d = x.reshape(-1, hidden)
    rows = x2d.shape[0]

    # Row tile: multiple of the packed sublane count for the input dtype.
    x_bytes = jnp.dtype(x.dtype).itemsize
    sub = {4: 8, 2: 16, 1: 32}.get(x_bytes, 8)
    tm = _round_up(min(row_tile, _round_up(rows, sub)), sub)

    # Intermediate (reduction) tile: multiple of 128 dividing `inter`.
    tn = _pick_inter_tile(inter, inter_tile)

    # Fit the tiles into the generation-aware VMEM budget (shrink tn, then tm).
    w_bytes = jnp.dtype(w_gu.dtype).itemsize
    o_bytes = jnp.dtype(out_dtype).itemsize
    cap = _vmem_cap_bytes() if vmem_cap_bytes is None else int(vmem_cap_bytes)
    while _vmem_estimate(tm, tn, hidden, x_bytes, w_bytes, o_bytes) > cap:
        if tn > 128:
            cand = _pick_inter_tile(inter, max(128, tn // 2))
            if cand < tn:
                tn = cand
                continue
        if tm > sub:
            tm = max(sub, _round_up(tm // 2, sub))
            continue
        break

    # Pad rows to a multiple of the row tile (padding is sliced off below).
    rows_p = _round_up(rows, tm)
    if rows_p != rows:
        x2d = jnp.pad(x2d, ((0, rows_p - rows), (0, 0)))

    grid = (rows_p // tm, inter // tn)

    est = _vmem_estimate(tm, tn, hidden, x_bytes, w_bytes, o_bytes)
    vmem_limit = int(min(max(est + (2 << 20), 16 << 20), cap))

    # TODO(synk): for decode-shaped calls on v7x (rows <= tm), add a leading
    # parallel grid axis of size 2 that halves the reduction per TensorCore
    # (partial f32 outputs summed afterwards) so the second core is not idle;
    # optionally pipeline_mode=pl.Buffered(3) on the weight specs if a trace
    # shows exposed weight DMA at small row tiles.
    out = pl.pallas_call(
        _mlp_kernel,
        out_shape=jax.ShapeDtypeStruct((rows_p, hidden), out_dtype),
        grid_spec=pltpu.PrefetchScalarGridSpec(
            num_scalar_prefetch=0,
            grid=grid,
            in_specs=[
                pl.BlockSpec((tm, hidden), lambda i, j: (i, 0)),        # x
                pl.BlockSpec((2, tn, hidden), lambda i, j: (0, j, 0)),  # [Wg;Wu]
                pl.BlockSpec((hidden, tn), lambda i, j: (0, j)),        # W_down
            ],
            out_specs=pl.BlockSpec((tm, hidden), lambda i, j: (i, 0)),
            scratch_shapes=[pltpu.VMEM((tm, hidden), jnp.float32)],
        ),
        compiler_params=pltpu.CompilerParams(
            dimension_semantics=("parallel", "arbitrary"),
            vmem_limit_bytes=vmem_limit,
        ),
    )(x2d, w_gu, w_down)

    if rows_p != rows:
        out = out[:rows]
    return out.reshape(orig_shape[:-1] + (hidden,))


def qwen2_mlp(x, w_gate, w_up, w_down, **kwargs):
    """Convenience wrapper taking raw PyTorch-layout weights.

    For production use, call prepare_qwen2_mlp_weights() once and reuse the
    prepared weights with qwen2_mlp_prepared() so the gate/up stack is not
    re-materialized per call.
    """
    w_gu, w_d = prepare_qwen2_mlp_weights(w_gate, w_up, w_down)
    return qwen2_mlp_prepared(x, w_gu, w_d, **kwargs)


if __name__ == "__main__":
    # Small shapes consistent with the module (batch, seq, hidden) + MLP dims.
    batch, seq, hidden, inter = 2, 8, 32, 256

    key = jax.random.PRNGKey(0)
    kx, kg, ku, kd = jax.random.split(key, 4)
    x = jax.random.normal(kx, (batch, seq, hidden), dtype=jnp.float32)
    # PyTorch nn.Linear layout: (out_features, in_features), no bias.
    w_gate = jax.random.normal(kg, (inter, hidden), dtype=jnp.float32) * 0.1
    w_up = jax.random.normal(ku, (inter, hidden), dtype=jnp.float32) * 0.1
    w_down = jax.random.normal(kd, (hidden, inter), dtype=jnp.float32) * 0.1

    # One-time weight prep (no transposes; just the gate/up stack).
    w_gu, w_d = prepare_qwen2_mlp_weights(w_gate, w_up, w_down)

    # inter_tile=128 exercises the accumulation over intermediate tiles.
    out = qwen2_mlp_prepared(x, w_gu, w_d, inter_tile=128)
    out = jax.block_until_ready(out)

    # Pure-JAX reference mirroring the PyTorch forward.
    x2 = x.reshape(-1, hidden)
    ref = (jax.nn.silu(x2 @ w_gate.T) * (x2 @ w_up.T)) @ w_down.T
    ref = ref.reshape(x.shape)
    assert jnp.allclose(out, ref, atol=1e-2, rtol=1e-2), "mismatch vs reference"

    # Ragged rows path (batch*seq not a multiple of the row tile) via padding,
    # through the convenience raw-weight wrapper and default tiles.
    x_odd = jax.random.normal(kx, (1, 5, hidden), dtype=jnp.float32)
    out_odd = jax.block_until_ready(qwen2_mlp(x_odd, w_gate, w_up, w_down))
    x2o = x_odd.reshape(-1, hidden)
    ref_odd = ((jax.nn.silu(x2o @ w_gate.T) * (x2o @ w_up.T)) @ w_down.T
               ).reshape(x_odd.shape)
    assert jnp.allclose(out_odd, ref_odd, atol=1e-2, rtol=1e-2), \
        "mismatch vs reference (ragged rows)"

    print("KERNEL_OK")
</pallas_src>

<mosaic_0001>
module attributes {stable_mosaic.version = 11 : i64} {
  func.func @_mlp_kernel(%arg0: i32, %arg1: i32, %arg2: memref<16x32xf32, #tpu.memory_space<vmem>>, %arg3: memref<2x128x32xf32, #tpu.memory_space<vmem>>, %arg4: memref<32x128xf32, #tpu.memory_space<vmem>>, %arg5: memref<16x32xf32, #tpu.memory_space<vmem>>, %arg6: memref<16x32xf32, #tpu.memory_space<vmem>>) attributes {dimension_semantics = [#tpu.dimension_semantics<parallel>, #tpu.dimension_semantics<arbitrary>], iteration_bounds = array<i64: 1, 2>, scalar_prefetch = 0 : i64, scratch_operands = 1 : i64, tpu.core_type = #tpu.core_type<tc>, window_params = [{transform_indices = @transform_0, window_bounds = array<i64: 16, 32>}, {transform_indices = @transform_1, window_bounds = array<i64: 2, 128, 32>}, {transform_indices = @transform_2, window_bounds = array<i64: 32, 128>}, {transform_indices = @transform_3, window_bounds = array<i64: 16, 32>}]} {
    %c0 = arith.constant 0 : index
    %c0_0 = arith.constant 0 : index
    %0 = vector.load %arg2[%c0, %c0_0] : memref<16x32xf32, #tpu.memory_space<vmem>>, vector<16x32xf32>
    %c0_1 = arith.constant 0 : index
    %c0_2 = arith.constant 0 : index
    %c0_3 = arith.constant 0 : index
    %1 = vector.load %arg3[%c0_1, %c0_2, %c0_3] : memref<2x128x32xf32, #tpu.memory_space<vmem>>, vector<2x128x32xf32>
    %2 = vector.shape_cast %1 : vector<2x128x32xf32> to vector<256x32xf32>
    %cst = arith.constant dense<0.000000e+00> : vector<16x256xf32>
    %3 = tpu.matmul %0, %2, %cst {dimension_numbers = #tpu.dot_dimension_numbers<[1], [1], [0], [0], [0, 0, 1, 0], [], []>} : vector<16x32xf32>, vector<256x32xf32>, vector<16x256xf32> -> vector<16x256xf32>
    %4 = vector.extract_strided_slice %3 {offsets = [0, 0], sizes = [16, 128], strides = [1, 1]} : vector<16x256xf32> to vector<16x128xf32>
    %5 = vector.extract_strided_slice %3 {offsets = [0, 128], sizes = [16, 128], strides = [1, 1]} : vector<16x256xf32> to vector<16x128xf32>
    %6 = arith.negf %4 : vector<16x128xf32>
    %7 = math.exp %6 : vector<16x128xf32>
    %cst_4 = arith.constant 1.000000e+00 : f32
    %8 = vector.broadcast %cst_4 : f32 to vector<16x128xf32>
    %9 = arith.addf %8, %7 : vector<16x128xf32>
    %10 = arith.divf %8, %9 : vector<16x128xf32>
    %11 = arith.mulf %4, %10 : vector<16x128xf32>
    %12 = arith.mulf %11, %5 : vector<16x128xf32>
    %c0_5 = arith.constant 0 : index
    %c0_6 = arith.constant 0 : index
    %13 = vector.load %arg4[%c0_5, %c0_6] : memref<32x128xf32, #tpu.memory_space<vmem>>, vector<32x128xf32>
    %cst_7 = arith.constant dense<0.000000e+00> : vector<16x32xf32>
    %14 = tpu.matmul %12, %13, %cst_7 {dimension_numbers = #tpu.dot_dimension_numbers<[1], [1], [0], [0], [0, 0, 1, 0], [], []>} : vector<16x128xf32>, vector<32x128xf32>, vector<16x32xf32> -> vector<16x32xf32>
    %c0_i32 = arith.constant 0 : i32
    %15 = arith.cmpi eq, %arg1, %c0_i32 : i32
    %16 = arith.extui %15 : i1 to i32
    %c0_i32_8 = arith.constant 0 : i32
    %17 = arith.cmpi ne, %16, %c0_i32_8 : i32
    scf.if %17 {
      %c0_12 = arith.constant 0 : index
      %c0_13 = arith.constant 0 : index
      %24 = vector.load %arg6[%c0_12, %c0_13] : memref<16x32xf32, #tpu.memory_space<vmem>>, vector<16x32xf32>
      tpu.vector_store %arg6[%c0_12, %c0_13], %14 {strides = array<i32>} : memref<16x32xf32, #tpu.memory_space<vmem>>, vector<16x32xf32>,
    } else {
    }
    %c0_i32_9 = arith.constant 0 : i32
    %18 = arith.cmpi sgt, %arg1, %c0_i32_9 : i32
    %19 = arith.extui %18 : i1 to i32
    %c0_i32_10 = arith.constant 0 : i32
    %20 = arith.cmpi ne, %19, %c0_i32_10 : i32
    scf.if %20 {
      %c0_12 = arith.constant 0 : index
      %c0_13 = arith.constant 0 : index
      %24 = vector.load %arg6[%c0_12, %c0_13] : memref<16x32xf32, #tpu.memory_space<vmem>>, vector<16x32xf32>
      %25 = arith.addf %24, %14 : vector<16x32xf32>
      %c0_14 = arith.constant 0 : index
      %c0_15 = arith.constant 0 : index
      %26 = vector.load %arg6[%c0_14, %c0_15] : memref<16x32xf32, #tpu.memory_space<vmem>>, vector<16x32xf32>
      tpu.vector_store %arg6[%c0_14, %c0_15], %25 {strides = array<i32>} : memref<16x32xf32, #tpu.memory_space<vmem>>, vector<16x32xf32>,
    } else {
    }
    %c1_i32 = arith.constant 1 : i32
    %21 = arith.cmpi eq, %arg1, %c1_i32 : i32
    %22 = arith.extui %21 : i1 to i32
    %c0_i32_11 = arith.constant 0 : i32
    %23 = arith.cmpi ne, %22, %c0_i32_11 : i32
    scf.if %23 {
      %c0_12 = arith.constant 0 : index
      %c0_13 = arith.constant 0 : index
      %24 = vector.load %arg6[%c0_12, %c0_13] : memref<16x32xf32, #tpu.memory_space<vmem>>, vector<16x32xf32>
      %c0_14 = arith.constant 0 : index
      %c0_15 = arith.constant 0 : index
      %25 = vector.load %arg5[%c0_14, %c0_15] : memref<16x32xf32, #tpu.memory_space<vmem>>, vector<16x32xf32>
      tpu.vector_store %arg5[%c0_14, %c0_15], %24 {strides = array<i32>} : memref<16x32xf32, #tpu.memory_space<vmem>>, vector<16x32xf32>,
    } else {
    }
    return
  }
  func.func @transform_0(%arg0: i32, %arg1: i32) -> (i32, i32) {
    %c0_i32 = arith.constant 0 : i32
    %c0_i32_0 = arith.constant 0 : i32
    return %arg0, %c0_i32 : i32, i32
  }
  func.func @transform_1(%arg0: i32, %arg1: i32) -> (i32, i32, i32) {
    %c0_i32 = arith.constant 0 : i32
    %c0_i32_0 = arith.constant 0 : i32
    %c0_i32_1 = arith.constant 0 : i32
    return %c0_i32, %arg1, %c0_i32_0 : i32, i32, i32
  }
  func.func @transform_2(%arg0: i32, %arg1: i32) -> (i32, i32) {
    %c0_i32 = arith.constant 0 : i32
    %c0_i32_0 = arith.constant 0 : i32
    return %c0_i32, %arg1 : i32, i32
  }
  func.func @transform_3(%arg0: i32, %arg1: i32) -> (i32, i32) {
    %c0_i32 = arith.constant 0 : i32
    %c0_i32_0 = arith.constant 0 : i32
    return %arg0, %c0_i32 : i32, i32
  }
}

</mosaic_0001>

<bundles_post_ra>
// kernel: tpu_custom_call.1
= control target key start
LH: loop header
LB: loop body
LE: loop exit
PB: predicated region body
PF: predicated region fallthrough
CT: control target
= control target key end

     0   :  { %8 = vsyncpa [#allocation6], 0  ;;  %s1116_s12 = smov 0   ;;  %s1118_s13 = smov 0   ;;  %s1369_s0 = inlined_call_operand.vmem [shape: f32[16,32], index: 0, kind: input, shape index: {}]   ;;  %s1370_s1 = inlined_call_operand.vmem [shape: f32[2,256,32], index: 1, kind: input, shape index: {}]   ;;  %s1371_s2 = inlined_call_operand.vmem [shape: f32[32,256], index: 2, kind: input, shape index: {}]   ;;  %s1372_s3 = inlined_call_operand.hbm [shape: f32[16,32], index: 3, kind: output, shape index: {}]  }
   0x1   :  { %s1120_s14 = smov 0   ;;  %s1122_s15 = smov 0  }
   0x2   :  { %s1124_s16 = smov 0  }
   0x3 LB: > { %s859_s17 = sadd.s32 4294967295, %s1091_s16   ;;  %s23_s18 = sadd.s32 1, %s1087_s15  ;;  %s1091_s16 = sphi %s1124_s16, %s14_s16   ;;  %s1087_s15 = sphi %s1122_s15, %s1378_s15   ;;  %s1083_s14 = sphi %s1120_s14, %s1377_s14   ;;  %s1079_s13 = sphi %s1118_s13, %s1376_s13   ;;  %s1075_s12 = sphi %s1116_s12, %s1375_s12  }
   0x4   : > { %p24_p0 = scmp.ge.s32.totalorder %s23_s18, 2  ;;  %p66_p1 = scmp.ne.s32.totalorder %s1079_s13, %s1075_s12 }
   0x5   : > { %p67_p2 = scmp.eq.s32.totalorder %s1091_s16, 0  ;;  %s59_s21 = sadd.s32 1, %s1079_s13 }
   0x6   : > { %s1380_s18 = smov (%p24_p0, %s23_s18), 0  ;;  %p862_p5 = scmp.ge.s32.totalorder %s1091_s16, 2 }
   0x7   : > { %p1148_p3 = por %p67_p2, %p66_p1  ;;  %s56_s20 = ssub.s32 %s1087_s15, %s1380_s18 }
   0x8   : > { %p57_p4 = scmp.eq.s32.totalorder %s56_s20, 0  ;;  %153 = sbr.rel (%p862_p5) target bundleno = 39 (0x27), region = 20 }
   0xa   : > { %s1156_s22 = scalar_select %p57_p4, %s1079_s13, %s59_s21  }
   0xd   : > { %156 = sbr.rel (!%p1148_p3) target bundleno = 33 (0x21), region = 24  ;;  %s158_s23 = sand.u32 (%p1148_p3), 1, %s1079_s13  }
   0xe   : > { %s914_s24 = sshll.u32 (%p1148_p3), %s1087_s15, 7  ;;  %s863_s25 = sshll.u32 (%p1148_p3), %s158_s23, 8 }
   0xf   : > { %s1166_s28 = scalar_lea.vmem (%p1148_p3), %s1370_s1, %s914_s24  ;;  %s1171_s29 = scalar_lea.vmem (%p1148_p3), [#allocation3], %s863_s25 }
  0x10   : > { %v254_v0 = vld [vmem:[%s1166_s28] sm:$0xff] (%p1148_p3)  ;;  %v256_v1 = vld [vmem:[%s1166_s28 + $0x8] sm:$0xff] (%p1148_p3)  ;;  %v258_v2 = vld [vmem:[%s1166_s28 + $0x10] sm:$0xff] (%p1148_p3) }
  0x11   : > { %255 = vst [vmem:[%s1171_s29] sm:$0xff] (%p1148_p3), %v254_v0  ;;  %257 = vst [vmem:[%s1171_s29 + $0x8] sm:$0xff] (%p1148_p3), %v256_v1  ;;  %v260_v3 = vld [vmem:[%s1166_s28 + $0x18] sm:$0xff] (%p1148_p3)  ;;  %v262_v4 = vld [vmem:[%s1166_s28 + $0x20] sm:$0xff] (%p1148_p3) }
  0x12   : > { %259 = vst [vmem:[%s1171_s29 + $0x10] sm:$0xff] %v258_v2  ;;  %v264_v5 = vld [vmem:[%s1166_s28 + $0x28] sm:$0xff]  ;;  %261 = vst [vmem:[%s1171_s29 + $0x18] sm:$0xff] %v260_v3  ;;  %v266_v6 = vld [vmem:[%s1166_s28 + $0x30] sm:$0xff] }
  0x13   : > { %263 = vst [vmem:[%s1171_s29 + $0x20] sm:$0xff] %v262_v4  ;;  %265 = vst [vmem:[%s1171_s29 + $0x28] sm:$0xff] %v264_v5  ;;  %v268_v7 = vld [vmem:[%s1166_s28 + $0x38] sm:$0xff]  ;;  %v270_v8 = vld [vmem:[%s1166_s28 + $0x40] sm:$0xff] }
  0x14   : > { %267 = vst [vmem:[%s1171_s29 + $0x30] sm:$0xff] %v266_v6  ;;  %269 = vst [vmem:[%s1171_s29 + $0x38] sm:$0xff] %v268_v7  ;;  %v272_v9 = vld [vmem:[%s1166_s28 + $0x48] sm:$0xff]  ;;  %v274_v10 = vld [vmem:[%s1166_s28 + $0x50] sm:$0xff] }
  0x15   : > { %271 = vst [vmem:[%s1171_s29 + $0x40] sm:$0xff] %v270_v8  ;;  %v276_v11 = vld [vmem:[%s1166_s28 + $0x58] sm:$0xff]  ;;  %273 = vst [vmem:[%s1171_s29 + $0x48] sm:$0xff] %v272_v9  ;;  %v278_v12 = vld [vmem:[%s1166_s28 + $0x60] sm:$0xff] }
  0x16   : > { %275 = vst [vmem:[%s1171_s29 + $0x50] sm:$0xff] %v274_v10  ;;  %277 = vst [vmem:[%s1171_s29 + $0x58] sm:$0xff] %v276_v11  ;;  %v280_v13 = vld [vmem:[%s1166_s28 + $0x68] sm:$0xff]  ;;  %v282_v14 = vld [vmem:[%s1166_s28 + $0x70] sm:$0xff] }
  0x17   : > { %279 = vst [vmem:[%s1171_s29 + $0x60] sm:$0xff] %v278_v12  ;;  %281 = vst [vmem:[%s1171_s29 + $0x68] sm:$0xff] %v280_v13  ;;  %v284_v15 = vld [vmem:[%s1166_s28 + $0x78] sm:$0xff]  ;;  %v286_v16 = vld [vmem:[%s1166_s28 + $0x100] sm:$0xff] }
  0x18   : > { %283 = vst [vmem:[%s1171_s29 + $0x70] sm:$0xff] %v282_v14  ;;  %v288_v17 = vld [vmem:[%s1166_s28 + $0x108] sm:$0xff]  ;;  %285 = vst [vmem:[%s1171_s29 + $0x78] sm:$0xff] %v284_v15  ;;  %v290_v18 = vld [vmem:[%s1166_s28 + $0x110] sm:$0xff] }
  0x19   : > { %287 = vst [vmem:[%s1171_s29 + $0x80] sm:$0xff] %v286_v16  ;;  %289 = vst [vmem:[%s1171_s29 + $0x88] sm:$0xff] %v288_v17  ;;  %v292_v19 = vld [vmem:[%s1166_s28 + $0x118] sm:$0xff]  ;;  %v294_v20 = vld [vmem:[%s1166_s28 + $0x120] sm:$0xff] }
  0x1a   : > { %291 = vst [vmem:[%s1171_s29 + $0x90] sm:$0xff] %v290_v18  ;;  %293 = vst [vmem:[%s1171_s29 + $0x98] sm:$0xff] %v292_v19  ;;  %v296_v21 = vld [vmem:[%s1166_s28 + $0x128] sm:$0xff]  ;;  %v298_v22 = vld [vmem:[%s1166_s28 + $0x130] sm:$0xff] }
  0x1b   : > { %295 = vst [vmem:[%s1171_s29 + $0xa0] sm:$0xff] %v294_v20  ;;  %v300_v23 = vld [vmem:[%s1166_s28 + $0x138] sm:$0xff]  ;;  %297 = vst [vmem:[%s1171_s29 + $0xa8] sm:$0xff] %v296_v21  ;;  %v302_v24 = vld [vmem:[%s1166_s28 + $0x140] sm:$0xff] }
  0x1c   : > { %299 = vst [vmem:[%s1171_s29 + $0xb0] sm:$0xff] %v298_v22  ;;  %301 = vst [vmem:[%s1171_s29 + $0xb8] sm:$0xff] %v300_v23  ;;  %v304_v25 = vld [vmem:[%s1166_s28 + $0x148] sm:$0xff]  ;;  %v306_v26 = vld [vmem:[%s1166_s28 + $0x150] sm:$0xff] }
  0x1d   : > { %303 = vst [vmem:[%s1171_s29 + $0xc0] sm:$0xff] %v302_v24  ;;  %305 = vst [vmem:[%s1171_s29 + $0xc8] sm:$0xff] %v304_v25  ;;  %v308_v27 = vld [vmem:[%s1166_s28 + $0x158] sm:$0xff]  ;;  %v310_v28 = vld [vmem:[%s1166_s28 + $0x160] sm:$0xff] }
  0x1e   : > { %307 = vst [vmem:[%s1171_s29 + $0xd0] sm:$0xff] %v306_v26  ;;  %v312_v29 = vld [vmem:[%s1166_s28 + $0x168] sm:$0xff]  ;;  %309 = vst [vmem:[%s1171_s29 + $0xd8] sm:$0xff] %v308_v27  ;;  %v314_v30 = vld [vmem:[%s1166_s28 + $0x170] sm:$0xff] }
  0x1f   : > { %311 = vst [vmem:[%s1171_s29 + $0xe0] sm:$0xff] %v310_v28  ;;  %313 = vst [vmem:[%s1171_s29 + $0xe8] sm:$0xff] %v312_v29  ;;  %v316_v31 = vld [vmem:[%s1166_s28 + $0x178] sm:$0xff] }
  0x20   : > { %315 = vst [vmem:[%s1171_s29 + $0xf0] sm:$0xff] %v314_v30  ;;  %317 = vst [vmem:[%s1171_s29 + $0xf8] sm:$0xff] %v316_v31 }
  0x21 PF: > { %323 = sbr.rel (!%p1148_p3) target bundleno = 39 (0x27), region = 62  ;;  %s325_s30 = sand.u32 (%p1148_p3), 1, %s1079_s13  }
  0x22   : > { %s867_s4 = sshll.u32 (%p1148_p3), %s1087_s15, 3  ;;  %s866_s5 = sshll.u32 (%p1148_p3), %s325_s30, 5 }
  0x23   : > { %s329_s8 = scalar_lea.vmem (%p1148_p3), %s1371_s2, %s867_s4  ;;  %s327_s9 = scalar_lea.vmem (%p1148_p3), [#allocation4], %s866_s5 }
  0x24   : > { %v364_v32 = vld [vmem:[%s329_s8] sm:$0xff] (%p1148_p3)  ;;  %v366_v33 = vld [vmem:[%s329_s8 + $0x10] sm:$0xff] (%p1148_p3) }
  0x25   : > { %v368_v34 = vld [vmem:[%s329_s8 + $0x20] sm:$0xff] (%p1148_p3)  ;;  %365 = vst [vmem:[%s327_s9] sm:$0xff] (%p1148_p3), %v364_v32  ;;  %367 = vst [vmem:[%s327_s9 + $0x8] sm:$0xff] (%p1148_p3), %v366_v33  ;;  %v370_v35 = vld [vmem:[%s329_s8 + $0x30] sm:$0xff] (%p1148_p3) }
  0x26   : > { %369 = vst [vmem:[%s327_s9 + $0x10] sm:$0xff] %v368_v34  ;;  %371 = vst [vmem:[%s327_s9 + $0x18] sm:$0xff] %v370_v35 }
  0x27 PF: > { %p868_p6 = scmp.ge.s32.totalorder %s1091_s16, 1  ;;  %p376_p7 = scmp.lt.s32.totalorder %s1091_s16, 3 }
  0x29   : > { %p377_p8 = pnand %p868_p6, %p376_p7 }
  0x2a   : > { %s383_s10 = sand.u32 (!%p377_p8), 1, %s1075_s12   ;;  %p907_p9 = scmp.ne.s32.totalorder (!%p377_p8), %s1083_s14, 0 }
  0x2b   : > { %380 = sbr.rel (%p377_p8) target bundleno = 578 (0x242), region = 100  ;;  %s869_s20 = sshll.u32 (!%p377_p8), %s383_s10, 8 }
  0x2c   : > { %s1253_s21 = scalar_lea.vmem (!%p377_p8), [#allocation3], %s869_s20  ;;  %s870_s25 = sshll.u32 (!%p377_p8), %s383_s10, 5 }
  0x2d   : > { %s392_s26 = scalar_lea.vmem (!%p377_p8), [#allocation4], %s870_s25 }
  0x30   : > { %vm459_vm0 = vcmask 261120   ;;  %v1247_v36 = vld [vmem:[%s1369_s0] sm:$0xff]  ;;  %v458_v37 = vld [vmem:[%s1253_s21 + $0xf8] sm:$0xff]  ;;  %v456_v41 = vld [vmem:[%s1253_s21 + $0xe8] sm:$0xff] }
  0x31   : > { %947 = vmatprep.mubr.msk.f32.mxu0 %vm459_vm0, %v1247_v36  ;;  %v442_v38 = vld [vmem:[%s1253_s21 + $0x78] sm:$0xff]  ;;  %v457_v39 = vld [vmem:[%s1253_s21 + $0xf0] sm:$0xff]  ;;  %915 = vmatprep.subr.msk.mxu0 %vm459_vm0, %v458_v37  ;;  %v440_v42 = vld [vmem:[%s1253_s21 + $0x68] sm:$0xff] }
  0x32   : > { %916 = vmatpush3.xpose.msk.msra.mxu0 %vm459_vm0, %v442_v38  ;;  %v441_v40 = vld [vmem:[%s1253_s21 + $0x70] sm:$0xff]  ;;  %v455_v43 = vld [vmem:[%s1253_s21 + $0xe0] sm:$0xff]  ;;  %v454_v45 = vld [vmem:[%s1253_s21 + $0xd8] sm:$0xff] }
  0x33   : > { %917 = vmatprep.subr.msk.mxu0 %vm459_vm0, %v457_v39  ;;  %v439_v44 = vld [vmem:[%s1253_s21 + $0x60] sm:$0xff]  ;;  %v438_v46 = vld [vmem:[%s1253_s21 + $0x58] sm:$0xff]  ;;  %v453_v47 = vld [vmem:[%s1253_s21 + $0xd0] sm:$0xff] }
  0x34   : > { %v437_v48 = vld [vmem:[%s1253_s21 + $0x50] sm:$0xff]  ;;  %v452_v49 = vld [vmem:[%s1253_s21 + $0xc8] sm:$0xff]  ;;  %v451_v51 = vld [vmem:[%s1253_s21 + $0xc0] sm:$0xff] }
  0x35   : > { %v436_v50 = vld [vmem:[%s1253_s21 + $0x48] sm:$0xff]  ;;  %v435_v52 = vld [vmem:[%s1253_s21 + $0x40] sm:$0xff]  ;;  %v450_v53 = vld [vmem:[%s1253_s21 + $0xb8] sm:$0xff] }
  0x36   : > { %918 = vmatpush3.xpose.msk.msra.mxu0 %vm459_vm0, %v441_v40  ;;  %v434_v54 = vld [vmem:[%s1253_s21 + $0x38] sm:$0xff]  ;;  %v449_v55 = vld [vmem:[%s1253_s21 + $0xb0] sm:$0xff]  ;;  %v448_v57 = vld [vmem:[%s1253_s21 + $0xa8] sm:$0xff] }
  0x37   : > { %919 = vmatprep.subr.msk.mxu0 %vm459_vm0, %v456_v41  ;;  %v433_v56 = vld [vmem:[%s1253_s21 + $0x30] sm:$0xff]  ;;  %v432_v58 = vld [vmem:[%s1253_s21 + $0x28] sm:$0xff]  ;;  %v447_v59 = vld [vmem:[%s1253_s21 + $0xa0] sm:$0xff] }
  0x38   : > { %v431_v60 = vld [vmem:[%s1253_s21 + $0x20] sm:$0xff]  ;;  %v446_v61 = vld [vmem:[%s1253_s21 + $0x98] sm:$0xff]  ;;  %v445_v63 = vld [vmem:[%s1253_s21 + $0x90] sm:$0xff] }
  0x39   : > { %v430_v62 = vld [vmem:[%s1253_s21 + $0x18] sm:$0xff]  ;;  %v429_v0 = vld [vmem:[%s1253_s21 + $0x10] sm:$0xff]  ;;  %v444_v1 = vld [vmem:[%s1253_s21 + $0x88] sm:$0xff] }
  0x3a   : > { %920 = vmatpush3.xpose.msk.msra.mxu0 %vm459_vm0, %v440_v42  ;;  %v428_v2 = vld [vmem:[%s1253_s21 + $0x8] sm:$0xff]  ;;  %v443_v3 = vld [vmem:[%s1253_s21 + $0x80] sm:$0xff]  ;;  %v426_v5 = vld [vmem:[%s1369_s0 + $0x8] sm:$0xff] }
  0x3b   : > { %921 = vmatprep.subr.msk.mxu0 %vm459_vm0, %v455_v43  ;;  %v427_v4 = vld [vmem:[%s1253_s21] sm:$0xff]  ;;  %v658_v6 = vld [vmem:[%s392_s26 + $0x18] sm:$0xff]  ;;  %v657_v7 = vld [vmem:[%s392_s26 + $0x10] sm:$0xff] }
  0x3c   : > { %957 = vmatprep.subr.mxu1 %v658_v6  ;;  %v656_v8 = vld [vmem:[%s392_s26 + $0x8] sm:$0xff]  ;;  %v655_v9 = vld [vmem:[%s392_s26] sm:$0xff] }
  0x3d   : > { %958 = vmatpush3.xpose.msra.mxu1 %v658_v6 }
  0x3e   : > { %922 = vmatpush3.xpose.msk.msra.mxu0 %vm459_vm0, %v439_v44  ;;  %959 = vmatprep.subr.mxu1 %v657_v7 }
  0x3f   : > { %923 = vmatprep.subr.msk.mxu0 %vm459_vm0, %v454_v45 }
  0x41   : > { %960 = vmatpush3.xpose.msra.mxu1 %v657_v7 }
  0x42   : > { %924 = vmatpush3.xpose.msk.msra.mxu0 %vm459_vm0, %v438_v46  ;;  %961 = vmatprep.subr.mxu1 %v656_v8 }
  0x43   : > { %925 = vmatprep.subr.msk.mxu0 %vm459_vm0, %v453_v47 }
  0x45   : > { %962 = vmatpush3.xpose.msra.mxu1 %v656_v8 }
  0x46   : > { %926 = vmatpush3.xpose.msk.msra.mxu0 %vm459_vm0, %v437_v48  ;;  %963 = vmatprep.subr.mxu1 %v655_v9 }
  0x47   : > { %927 = vmatprep.subr.msk.mxu0 %vm459_vm0, %v452_v49 }
  0x49   : > { %964 = vmatpush3.xpose.msra.mxu1 %v655_v9 }
  0x4a   : > { %928 = vmatpush3.xpose.msk.msra.mxu0 %vm459_vm0, %v436_v50 }
  0x4b   : > { %929 = vmatprep.subr.msk.mxu0 %vm459_vm0, %v451_v51 }
  0x4e   : > { %930 = vmatpush3.xpose.msk.msra.mxu0 %vm459_vm0, %v435_v52 }
  0x4f   : > { %931 = vmatprep.subr.msk.mxu0 %vm459_vm0, %v450_v53 }
  0x52   : > { %932 = vmatpush3.xpose.msk.msra.mxu0 %vm459_vm0, %v434_v54 }
  0x53   : > { %933 = vmatprep.subr.msk.mxu0 %vm459_vm0, %v449_v55 }
  0x56   : > { %934 = vmatpush3.xpose.msk.msra.mxu0 %vm459_vm0, %v433_v56 }
  0x57   : > { %935 = vmatprep.subr.msk.mxu0 %vm459_vm0, %v448_v57 }
  0x5a   : > { %936 = vmatpush3.xpose.msk.msra.mxu0 %vm459_vm0, %v432_v58 }
  0x5b   : > { %937 = vmatprep.subr.msk.mxu0 %vm459_vm0, %v447_v59 }
  0x5e   : > { %938 = vmatpush3.xpose.msk.msra.mxu0 %vm459_vm0, %v431_v60 }
  0x5f   : > { %939 = vmatprep.subr.msk.mxu0 %vm459_vm0, %v446_v61 }
  0x62   : > { %940 = vmatpush3.xpose.msk.msra.mxu0 %vm459_vm0, %v430_v62 }
  0x63   : > { %941 = vmatprep.subr.msk.mxu0 %vm459_vm0, %v445_v63 }
  0x66   : > { %942 = vmatpush3.xpose.msk.msra.mxu0 %vm459_vm0, %v429_v0 }
  0x67   : > { %943 = vmatprep.subr.msk.mxu0 %vm459_vm0, %v444_v1 }
  0x6a   : > { %944 = vmatpush3.xpose.msk.msra.mxu0 %vm459_vm0, %v428_v2 }
  0x6b   : > { %945 = vmatprep.subr.msk.mxu0 %vm459_vm0, %v443_v3 }
  0x6e   : > { %946 = vmatpush3.xpose.msk.msra.mxu0 %vm459_vm0, %v427_v4 }
  0x71   : > { %948 = vmatmul.mubr.msk.f32.vlgmr.msra.gmra.mxu0 %vm459_vm0, %v1247_v36 }
  0x72   : > { %949 = vmatprep.mubr.msk.f32.mxu0 %vm459_vm0, %v426_v5 }
  0x75   : > { %950 = vmatmul.mubr.msk.f32.gmra.mxu0 %vm459_vm0, %v426_v5 }
 0x131   : > { %v628_v10 = vpop.f32.mrf.mxu0 }
 0x132   : > { %v905_v11 = vmul.f32 -1.442695, %v628_v10 }
 0x133   : > { %v630_v12 = vpop.f32.mrf.mxu0 }
 0x134   : > { %1017 = vpow2.f32 %v905_v11 }
 0x135   : > { %v634_v13 = vpop.f32.mrf.mxu0 }
 0x136   : > { %v906_v14 = vmul.f32 -1.442695, %v634_v13 }
 0x137   : > { %v636_v24 = vpop.f32.mrf.mxu0 }
 0x138   : > { %1019 = vpow2.f32 %v906_v14 }
 0x141   : > { %v1018_v15 = vpop.eup %1017 }
 0x142   : > { %v645_v16 = vadd.f32 1.0, %v1018_v15 }
 0x144   : > { %1021 = vrcp.f32 %v645_v16 }
 0x145   : > { %v1020_v17 = vpop.eup %1019 }
 0x146   : > { %v646_v18 = vadd.f32 1.0, %v1020_v17 }
 0x148   : > { %1023 = vrcp.f32 %v646_v18 }
 0x151   : > { %v1022_v19 = vpop.eup %1021 }
 0x152   : > { %v651_v20 = vmul.f32 %v1022_v19, %v628_v10 }
 0x154   : > { %v653_v21 = vmul.f32 %v651_v20, %v630_v12 }
 0x155   : > { %v1024_v22 = vpop.eup %1023 }
 0x156   : > { %v652_v23 = vmul.f32 %v1024_v22, %v634_v13  ;;  %965 = vmatprep.mubr.f32.mxu1 %v653_v21 }
 0x158   : > { %v654_v25 = vmul.f32 %v652_v23, %v636_v24 }
 0x15a   : > { %966 = vmatmul.mubr.f32.vlgmr.msra.gmra.mxu1 %v654_v25 }
 0x218   : > { %737 = sbr.rel (%p907_p9) target bundleno = 542 (0x21e), region = 112 }
 0x21a   : > { %v967_v26 = vpop.f32.mrf.mxu1 }
 0x21c   : > { %v725_v27 = vpop.f32.mrf.mxu1 }
 0x21d   : > { %738 = vst.msk [vmem:[#allocation2] sm:$0xff] %vm459_vm0, %v725_v27  ;;  %739 = vst.msk [vmem:[#allocation2 + $0x8] sm:$0xff] %vm459_vm0, %v967_v26 }
 0x21e PF: > { %p908_p10 = scmp.le.s32.totalorder %s1083_s14, 0 }
 0x220   : > { %743 = sbr.rel (%p908_p10) target bundleno = 553 (0x229), region = 116 }
 0x225   : > { %v744_v28 = vld [vmem:[#allocation2] sm:$0xff]  ;;  %v745_v29 = vld [vmem:[#allocation2 + $0x8] sm:$0xff] }
 0x226   : > { %v746_v30 = vadd.f32 %v744_v28, %v725_v27  ;;  %v747_v31 = vadd.f32 %v967_v26, %v745_v29 }
 0x228   : > { %748 = vst.msk [vmem:[#allocation2] sm:$0xff] %vm459_vm0, %v746_v30  ;;  %749 = vst.msk [vmem:[#allocation2 + $0x8] sm:$0xff] %vm459_vm0, %v747_v31 }
 0x229 PF: > { %p909_p11 = scmp.ne.s32.totalorder %s1083_s14, 1 }
 0x22b   : > { %753 = sbr.rel (%p909_p11) target bundleno = 562 (0x232), region = 120 }
 0x230   : > { %v754_v32 = vld [vmem:[#allocation2] sm:$0xff]  ;;  %v755_v33 = vld [vmem:[#allocation2 + $0x8] sm:$0xff] }
 0x231   : > { %756 = vst.msk [vmem:[#allocation5] sm:$0xff] %vm459_vm0, %v754_v32  ;;  %757 = vst.msk [vmem:[#allocation5 + $0x8] sm:$0xff] %vm459_vm0, %v755_v33 }
 0x232 PF: > { %p1339_p12 = scmp.eq.s32.totalorder %s859_s17, 1  ;;  %s1093_s27 = smov [#allocation5]  }
 0x233   : > { %s767_s28 = sshll.u32 %s1093_s27, 4  ;;  %s768_s28 = int_to_ptr.vmem [resolvable:$true] %s767_s28 }
 0x234   : > { %s1025_s29 = scalar_lea.vmem %s768_s28, 256  ;;  %p1032_p2 = scmp.lt.s32.totalorder %s768_s28, %s768_s28 }
 0x235   : > { %p1026_p13 = scmp.ne.s32.totalorder %s768_s28, %s1025_s29  ;;  %p1033_p3 = scmp.lt.s32.totalorder %s1025_s29, %s1025_s29 }
 0x237   : > { %p1027_p0 = pnand %p1026_p13, %p1339_p12  ;;  %p1034_p4 = por %p1033_p3, %p1032_p2 }
 0x239   : > { %p1028_p1 = pneg %p1027_p0 }
 0x23b   : > { %p1035_p5 = pnand %p1034_p4, %p1028_p1 }
 0x23d   : > { %1038 = shalt.err (!%p1035_p5)
}
 0x23e   : > { %s1094_s14 = smov 128   ;;  %s1095_s17 = smov 8  }
 0x23f   : > { %969 = dma.vmem_to_hbm [thread:$0]  (%p1339_p12), %s768_s28, 256, %s1372_s3, [#allocation6], %s1094_s14, %s1094_s14, %s1095_s17  }
 0x240   : > { %1070 = dma.done.wait (%p1339_p12), [#allocation6], 256  }
 0x241   : > { %1072 = vsyncadd (%p1339_p12), [#allocation6], 4294967040 }
 0x242 PF: > { %s14_s16 = sadd.s32 1, %s1091_s16   ;;  %s1375_s12 = smov %s1079_s13 }
 0x243   : > { %p11_p6 = scmp.ge.s32.totalorder %s14_s16, 4   ;;  %s1376_s13 = smov %s1156_s22 }
 0x244   : > { %s1377_s14 = smov %s1087_s15  ;;  %s1378_s15 = smov %s1380_s18 }
 0x245   :  { %13 = sbr.rel (!%p11_p6) target bundleno = 3 (0x3), region = 164 }
 0x24a   :  { %783 = vsyncpa [#allocation6], 1 }
 0x24b   :  { %785 = vsyncpa [#allocation6 + $0x1], 1 }

</bundles_post_ra>
